<compile_context>
chip_gen: v7x
topology: tpu7x:2x2x1
jax: 0.10.0
libtpu: 0.0.40
codegen_flags: <defaults>
</compile_context>

<pallas_src>
import functools

import jax
import jax.numpy as jnp
import numpy as np
from jax.experimental import pallas as pl
from jax.experimental.pallas import tpu as pltpu


def _bottleneck_kernel(x_ref, w1t_ref, b1_ref, w2col_ref, b2_ref, mask_ref,
                       o_ref, *, W, add):
    # x_ref:     (C1, N*HW)     whole batch, spatial+batch flattened on lanes
    # w1t_ref:   (C_, C1)       folded 1x1 conv weight (transposed)
    # b1_ref:    (C_, 1)        folded 1x1 conv bias
    # w2col_ref: (C2, 9*C_)     folded 3x3 conv weight, im2col layout
    # b2_ref:    (C2, 1)        folded 3x3 conv bias
    # mask_ref:  (9, N*HW)      per-tap validity masks (row & col & same image)
    # o_ref:     (C2, N*HW)
    x = x_ref[...].astype(jnp.float32)                       # (C1, N*HW)

    # ---- cv1: 1x1 conv (+folded BN) + SiLU --- one MXU push for the batch ---
    y = jnp.dot(w1t_ref[...], x, preferred_element_type=jnp.float32)
    y = y + b1_ref[...]                                      # (C_, N*HW) + (C_, 1)
    y = y * jax.nn.sigmoid(y)                                # SiLU, full-width vregs

    # ---- cv2: 3x3 conv (+folded BN) as ONE im2col matmul ---------------------
    # Each tap is a static lane shift of y (jnp.roll with constant shift), with
    # wrapped / out-of-image / cross-image positions zeroed by the mask.  The 9
    # masked taps are stacked in registers -> single (C2, 9*C_)@(9*C_, N*HW) dot.
    mask = mask_ref[...]                                     # (9, N*HW)
    taps = []
    for kh in range(3):
        for kw in range(3):
            t = kh * 3 + kw
            s = (kh - 1) * W + (kw - 1)                      # flattened tap offset
            if s == 0:                                       # center tap: no shift,
                taps.append(y)                               # mask is all-ones
            else:
                tap = jnp.roll(y, -s, axis=1)                # tap[:, q] = y[:, q+s]
                taps.append(tap * mask[t:t + 1, :])
    col = jnp.concatenate(taps, axis=0)                      # (9*C_, N*HW)

    out = jnp.dot(w2col_ref[...], col, preferred_element_type=jnp.float32)
    out = out + b2_ref[...]                                  # bias added once
    out = out * jax.nn.sigmoid(out)                          # SiLU
    if add:
        out = out + x                                        # residual (reuses x)
    o_ref[...] = out.astype(o_ref.dtype)                     # unmasked lane-dense store


def bottleneck_pallas(x_nchw, w1, b1, w2, b2, *, add):
    """x_nchw: (N, C1, H, W). w1: (C1, C_), b1: (1, C_),
    w2: (3, 3, C_, C2) HWIO, b2: (1, C2).  BN already folded in."""
    N, C1, H, W = x_nchw.shape
    C_ = w1.shape[1]
    C2 = w2.shape[3]
    HW = H * W
    NHW = N * HW

    # Lane-dense re-layout: channels on sublanes, batch*spatial on lanes.
    x2d = jnp.transpose(x_nchw.reshape(N, C1, HW), (1, 0, 2)).reshape(C1, NHW)

    w1t = jnp.transpose(w1)                                  # (C_, C1)
    b1c = jnp.reshape(b1, (C_, 1))
    # im2col weight: column (kh*3+kw)*C_ + ci  <->  w2[kh, kw, ci, co]
    w2col = jnp.transpose(w2, (3, 0, 1, 2)).reshape(C2, 9 * C_)
    b2c = jnp.reshape(b2, (C2, 1))

    # Per-tap validity masks: position q (image n, row r, col c) is valid for
    # tap (dh, dw) iff 0 <= r+dh < H and 0 <= c+dw < W.  This also kills any
    # cross-image read of the flattened +/-W shifts in the concatenated batch.
    q = np.arange(NHW)
    p = q % HW
    r, c = p // W, p % W
    rows = []
    for kh in range(3):
        for kw in range(3):
            dh, dw = kh - 1, kw - 1
            rows.append((r + dh >= 0) & (r + dh < H) & (c + dw >= 0) & (c + dw < W))
    mask9 = jnp.asarray(np.stack(rows).astype(np.float32))   # (9, NHW)

    kernel = functools.partial(_bottleneck_kernel, W=W, add=add)

    out2d = pl.pallas_call(
        kernel,
        out_shape=jax.ShapeDtypeStruct((C2, NHW), x_nchw.dtype),
        grid_spec=pltpu.PrefetchScalarGridSpec(
            num_scalar_prefetch=0,
            grid=(1,),                                       # single fused step
            in_specs=[
                pl.BlockSpec((C1, NHW), lambda i: (0, 0)),
                pl.BlockSpec((C_, C1), lambda i: (0, 0)),
                pl.BlockSpec((C_, 1), lambda i: (0, 0)),
                pl.BlockSpec((C2, 9 * C_), lambda i: (0, 0)),
                pl.BlockSpec((C2, 1), lambda i: (0, 0)),
                pl.BlockSpec((9, NHW), lambda i: (0, 0)),
            ],
            out_specs=pl.BlockSpec((C2, NHW), lambda i: (0, 0)),
        ),
        compiler_params=pltpu.CompilerParams(
            dimension_semantics=("arbitrary",)),
    )(x2d, w1t, b1c, w2col, b2c, mask9)

    # Back to NCHW (layout plumbing outside the kernel).
    return jnp.transpose(out2d.reshape(C2, N, HW), (1, 0, 2)).reshape(N, C2, H, W)


def bottleneck_reference(x_nchw, w1, b1, w2, b2, *, add):
    """Pure-JAX reference (lax conv) for correctness check."""
    x = jnp.transpose(x_nchw, (0, 2, 3, 1))                  # NHWC
    y1 = jax.lax.conv_general_dilated(
        x, w1[None, None], (1, 1), 'VALID',
        dimension_numbers=('NHWC', 'HWIO', 'NHWC')) + b1
    y1 = y1 * jax.nn.sigmoid(y1)
    y2 = jax.lax.conv_general_dilated(
        y1, w2, (1, 1), ((1, 1), (1, 1)),
        dimension_numbers=('NHWC', 'HWIO', 'NHWC')) + b2
    y2 = y2 * jax.nn.sigmoid(y2)
    out = x + y2 if add else y2
    return jnp.transpose(out, (0, 3, 1, 2))


def _fold_bn(w_oihw, gamma, beta, mean, var, eps=1e-5):
    """Fold eval-mode BatchNorm into conv weight/bias.

    w_oihw: PyTorch-layout conv weight (Cout, Cin, kh, kw), no conv bias.
    Returns (w_hwio, bias) with bias shape (1, Cout).
    """
    scale = gamma / jnp.sqrt(var + eps)                      # (Cout,)
    w = w_oihw * scale[:, None, None, None]
    w_hwio = jnp.transpose(w, (2, 3, 1, 0))                  # (kh,kw,Cin,Cout)
    bias = (beta - mean * scale)[None, :]                    # (1, Cout)
    return w_hwio, bias


if __name__ == "__main__":
    # Module config: Bottleneck(c1=4, c2=4, shortcut=True, g=1, e=0.5)
    c1, c2, e = 4, 4, 0.5
    c_ = int(c2 * e)
    shortcut = True
    add = shortcut and (c1 == c2)

    key = jax.random.PRNGKey(0)
    ks = jax.random.split(key, 12)

    # Input (N, C, H, W) as in PyTorch.
    x = jax.random.normal(ks[0], (2, c1, 16, 16), jnp.float32)

    # cv1: Conv2d(c1, c_, 1, bias=False) + BatchNorm2d(c_)
    w1_oihw = jax.random.normal(ks[1], (c_, c1, 1, 1), jnp.float32) * 0.2
    g1 = 1.0 + 0.1 * jax.random.normal(ks[2], (c_,), jnp.float32)
    b1_bn = 0.1 * jax.random.normal(ks[3], (c_,), jnp.float32)
    m1 = 0.1 * jax.random.normal(ks[4], (c_,), jnp.float32)
    v1 = jnp.abs(jax.random.normal(ks[5], (c_,), jnp.float32)) + 0.5

    # cv2: Conv2d(c_, c2, 3, pad=1, bias=False) + BatchNorm2d(c2)
    w2_oihw = jax.random.normal(ks[6], (c2, c_, 3, 3), jnp.float32) * 0.2
    g2 = 1.0 + 0.1 * jax.random.normal(ks[7], (c2,), jnp.float32)
    b2_bn = 0.1 * jax.random.normal(ks[8], (c2,), jnp.float32)
    m2 = 0.1 * jax.random.normal(ks[9], (c2,), jnp.float32)
    v2 = jnp.abs(jax.random.normal(ks[10], (c2,), jnp.float32)) + 0.5

    # Fold BN (eval mode) into conv weights / biases.
    w1_hwio, b1 = _fold_bn(w1_oihw, g1, b1_bn, m1, v1)
    w1_2d = w1_hwio[0, 0]                                    # (c1, c_)
    w2_hwio, b2 = _fold_bn(w2_oihw, g2, b2_bn, m2, v2)        # (3,3,c_,c2)

    out = bottleneck_pallas(x, w1_2d, b1, w2_hwio, b2, add=add)
    out = jax.block_until_ready(out)

    ref = bottleneck_reference(x, w1_2d, b1, w2_hwio, b2, add=add)
    np.testing.assert_allclose(np.asarray(out), np.asarray(ref),
                               rtol=1e-4, atol=1e-4)

    print("KERNEL_OK")
</pallas_src>

<mosaic_0001>
module attributes {stable_mosaic.version = 11 : i64} {
  func.func @_bottleneck_kernel(%arg0: i32, %arg1: memref<4x512xf32, #tpu.memory_space<vmem>>, %arg2: memref<2x4xf32, #tpu.memory_space<vmem>>, %arg3: memref<2x1xf32, #tpu.memory_space<vmem>>, %arg4: memref<4x18xf32, #tpu.memory_space<vmem>>, %arg5: memref<4x1xf32, #tpu.memory_space<vmem>>, %arg6: memref<9x512xf32, #tpu.memory_space<vmem>>, %arg7: memref<4x512xf32, #tpu.memory_space<vmem>>) attributes {dimension_semantics = [#tpu.dimension_semantics<arbitrary>], iteration_bounds = array<i64: 1>, scalar_prefetch = 0 : i64, scratch_operands = 0 : i64, tpu.core_type = #tpu.core_type<tc>, window_params = [{pipeline_mode = #tpu.pipeline_mode<synchronous>, transform_indices = @transform_0, window_bounds = array<i64: 4, 512>}, {pipeline_mode = #tpu.pipeline_mode<synchronous>, transform_indices = @transform_1, window_bounds = array<i64: 2, 4>}, {pipeline_mode = #tpu.pipeline_mode<synchronous>, transform_indices = @transform_2, window_bounds = array<i64: 2, 1>}, {pipeline_mode = #tpu.pipeline_mode<synchronous>, transform_indices = @transform_3, window_bounds = array<i64: 4, 18>}, {pipeline_mode = #tpu.pipeline_mode<synchronous>, transform_indices = @transform_4, window_bounds = array<i64: 4, 1>}, {pipeline_mode = #tpu.pipeline_mode<synchronous>, transform_indices = @transform_5, window_bounds = array<i64: 9, 512>}, {pipeline_mode = #tpu.pipeline_mode<synchronous>, transform_indices = @transform_6, window_bounds = array<i64: 4, 512>}]} {
    %c0 = arith.constant 0 : index
    %c0_0 = arith.constant 0 : index
    %0 = vector.load %arg1[%c0, %c0_0] : memref<4x512xf32, #tpu.memory_space<vmem>>, vector<4x512xf32>
    %c0_1 = arith.constant 0 : index
    %c0_2 = arith.constant 0 : index
    %1 = vector.load %arg2[%c0_1, %c0_2] : memref<2x4xf32, #tpu.memory_space<vmem>>, vector<2x4xf32>
    %cst = arith.constant dense<0.000000e+00> : vector<2x512xf32>
    %2 = tpu.matmul %1, %0, %cst {dimension_numbers = #tpu.dot_dimension_numbers<[1], [0], [0], [1], [0, 0, 1, 1], [], []>} : vector<2x4xf32>, vector<4x512xf32>, vector<2x512xf32> -> vector<2x512xf32>
    %c0_3 = arith.constant 0 : index
    %c0_4 = arith.constant 0 : index
    %3 = vector.load %arg3[%c0_3, %c0_4] : memref<2x1xf32, #tpu.memory_space<vmem>>, vector<2x1xf32>
    %4 = vector.broadcast %3 : vector<2x1xf32> to vector<2x512xf32>
    %5 = arith.addf %2, %4 : vector<2x512xf32>
    %6 = arith.negf %5 : vector<2x512xf32>
    %7 = math.exp %6 : vector<2x512xf32>
    %cst_5 = arith.constant 1.000000e+00 : f32
    %8 = vector.broadcast %cst_5 : f32 to vector<2x512xf32>
    %9 = arith.addf %8, %7 : vector<2x512xf32>
    %10 = arith.divf %8, %9 : vector<2x512xf32>
    %11 = arith.mulf %5, %10 : vector<2x512xf32>
    %c0_6 = arith.constant 0 : index
    %c0_7 = arith.constant 0 : index
    %12 = vector.load %arg6[%c0_6, %c0_7] : memref<9x512xf32, #tpu.memory_space<vmem>>, vector<9x512xf32>
    %13 = vector.extract_strided_slice %11 {offsets = [0, 495], sizes = [2, 17], strides = [1, 1]} : vector<2x512xf32> to vector<2x17xf32>
    %14 = vector.extract_strided_slice %11 {offsets = [0, 0], sizes = [2, 495], strides = [1, 1]} : vector<2x512xf32> to vector<2x495xf32>
    %15 = tpu.concatenate %13, %14 in 1 : vector<2x17xf32>, vector<2x495xf32> -> vector<2x512xf32>
    %16 = vector.extract_strided_slice %12 {offsets = [0, 0], sizes = [1, 512], strides = [1, 1]} : vector<9x512xf32> to vector<1x512xf32>
    %17 = vector.broadcast %16 : vector<1x512xf32> to vector<2x512xf32>
    %18 = arith.mulf %15, %17 : vector<2x512xf32>
    %19 = vector.extract_strided_slice %11 {offsets = [0, 496], sizes = [2, 16], strides = [1, 1]} : vector<2x512xf32> to vector<2x16xf32>
    %20 = vector.extract_strided_slice %11 {offsets = [0, 0], sizes = [2, 496], strides = [1, 1]} : vector<2x512xf32> to vector<2x496xf32>
    %21 = tpu.concatenate %19, %20 in 1 : vector<2x16xf32>, vector<2x496xf32> -> vector<2x512xf32>
    %22 = vector.extract_strided_slice %12 {offsets = [1, 0], sizes = [1, 512], strides = [1, 1]} : vector<9x512xf32> to vector<1x512xf32>
    %23 = vector.broadcast %22 : vector<1x512xf32> to vector<2x512xf32>
    %24 = arith.mulf %21, %23 : vector<2x512xf32>
    %25 = vector.extract_strided_slice %11 {offsets = [0, 497], sizes = [2, 15], strides = [1, 1]} : vector<2x512xf32> to vector<2x15xf32>
    %26 = vector.extract_strided_slice %11 {offsets = [0, 0], sizes = [2, 497], strides = [1, 1]} : vector<2x512xf32> to vector<2x497xf32>
    %27 = tpu.concatenate %25, %26 in 1 : vector<2x15xf32>, vector<2x497xf32> -> vector<2x512xf32>
    %28 = vector.extract_strided_slice %12 {offsets = [2, 0], sizes = [1, 512], strides = [1, 1]} : vector<9x512xf32> to vector<1x512xf32>
    %29 = vector.broadcast %28 : vector<1x512xf32> to vector<2x512xf32>
    %30 = arith.mulf %27, %29 : vector<2x512xf32>
    %31 = vector.extract_strided_slice %11 {offsets = [0, 511], sizes = [2, 1], strides = [1, 1]} : vector<2x512xf32> to vector<2x1xf32>
    %32 = vector.extract_strided_slice %11 {offsets = [0, 0], sizes = [2, 511], strides = [1, 1]} : vector<2x512xf32> to vector<2x511xf32>
    %33 = tpu.concatenate %31, %32 in 1 : vector<2x1xf32>, vector<2x511xf32> -> vector<2x512xf32>
    %34 = vector.extract_strided_slice %12 {offsets = [3, 0], sizes = [1, 512], strides = [1, 1]} : vector<9x512xf32> to vector<1x512xf32>
    %35 = vector.broadcast %34 : vector<1x512xf32> to vector<2x512xf32>
    %36 = arith.mulf %33, %35 : vector<2x512xf32>
    %37 = vector.extract_strided_slice %11 {offsets = [0, 1], sizes = [2, 511], strides = [1, 1]} : vector<2x512xf32> to vector<2x511xf32>
    %38 = vector.extract_strided_slice %11 {offsets = [0, 0], sizes = [2, 1], strides = [1, 1]} : vector<2x512xf32> to vector<2x1xf32>
    %39 = tpu.concatenate %37, %38 in 1 : vector<2x511xf32>, vector<2x1xf32> -> vector<2x512xf32>
    %40 = vector.extract_strided_slice %12 {offsets = [5, 0], sizes = [1, 512], strides = [1, 1]} : vector<9x512xf32> to vector<1x512xf32>
    %41 = vector.broadcast %40 : vector<1x512xf32> to vector<2x512xf32>
    %42 = arith.mulf %39, %41 : vector<2x512xf32>
    %43 = vector.extract_strided_slice %11 {offsets = [0, 15], sizes = [2, 497], strides = [1, 1]} : vector<2x512xf32> to vector<2x497xf32>
    %44 = vector.extract_strided_slice %11 {offsets = [0, 0], sizes = [2, 15], strides = [1, 1]} : vector<2x512xf32> to vector<2x15xf32>
    %45 = tpu.concatenate %43, %44 in 1 : vector<2x497xf32>, vector<2x15xf32> -> vector<2x512xf32>
    %46 = vector.extract_strided_slice %12 {offsets = [6, 0], sizes = [1, 512], strides = [1, 1]} : vector<9x512xf32> to vector<1x512xf32>
    %47 = vector.broadcast %46 : vector<1x512xf32> to vector<2x512xf32>
    %48 = arith.mulf %45, %47 : vector<2x512xf32>
    %49 = vector.extract_strided_slice %11 {offsets = [0, 16], sizes = [2, 496], strides = [1, 1]} : vector<2x512xf32> to vector<2x496xf32>
    %50 = vector.extract_strided_slice %11 {offsets = [0, 0], sizes = [2, 16], strides = [1, 1]} : vector<2x512xf32> to vector<2x16xf32>
    %51 = tpu.concatenate %49, %50 in 1 : vector<2x496xf32>, vector<2x16xf32> -> vector<2x512xf32>
    %52 = vector.extract_strided_slice %12 {offsets = [7, 0], sizes = [1, 512], strides = [1, 1]} : vector<9x512xf32> to vector<1x512xf32>
    %53 = vector.broadcast %52 : vector<1x512xf32> to vector<2x512xf32>
    %54 = arith.mulf %51, %53 : vector<2x512xf32>
    %55 = vector.extract_strided_slice %11 {offsets = [0, 17], sizes = [2, 495], strides = [1, 1]} : vector<2x512xf32> to vector<2x495xf32>
    %56 = vector.extract_strided_slice %11 {offsets = [0, 0], sizes = [2, 17], strides = [1, 1]} : vector<2x512xf32> to vector<2x17xf32>
    %57 = tpu.concatenate %55, %56 in 1 : vector<2x495xf32>, vector<2x17xf32> -> vector<2x512xf32>
    %58 = vector.extract_strided_slice %12 {offsets = [8, 0], sizes = [1, 512], strides = [1, 1]} : vector<9x512xf32> to vector<1x512xf32>
    %59 = vector.broadcast %58 : vector<1x512xf32> to vector<2x512xf32>
    %60 = arith.mulf %57, %59 : vector<2x512xf32>
    %61 = tpu.concatenate %18, %24, %30, %36, %11, %42, %48, %54, %60 in 0 : vector<2x512xf32>, vector<2x512xf32>, vector<2x512xf32>, vector<2x512xf32>, vector<2x512xf32>, vector<2x512xf32>, vector<2x512xf32>, vector<2x512xf32>, vector<2x512xf32> -> vector<18x512xf32>
    %c0_8 = arith.constant 0 : index
    %c0_9 = arith.constant 0 : index
    %62 = vector.load %arg4[%c0_8, %c0_9] : memref<4x18xf32, #tpu.memory_space<vmem>>, vector<4x18xf32>
    %cst_10 = arith.constant dense<0.000000e+00> : vector<4x512xf32>
    %63 = tpu.matmul %62, %61, %cst_10 {dimension_numbers = #tpu.dot_dimension_numbers<[1], [0], [0], [1], [0, 0, 1, 1], [], []>} : vector<4x18xf32>, vector<18x512xf32>, vector<4x512xf32> -> vector<4x512xf32>
    %c0_11 = arith.constant 0 : index
    %c0_12 = arith.constant 0 : index
    %64 = vector.load %arg5[%c0_11, %c0_12] : memref<4x1xf32, #tpu.memory_space<vmem>>, vector<4x1xf32>
    %65 = vector.broadcast %64 : vector<4x1xf32> to vector<4x512xf32>
    %66 = arith.addf %63, %65 : vector<4x512xf32>
    %67 = arith.negf %66 : vector<4x512xf32>
    %68 = math.exp %67 : vector<4x512xf32>
    %cst_13 = arith.constant 1.000000e+00 : f32
    %69 = vector.broadcast %cst_13 : f32 to vector<4x512xf32>
    %70 = arith.addf %69, %68 : vector<4x512xf32>
    %71 = arith.divf %69, %70 : vector<4x512xf32>
    %72 = arith.mulf %66, %71 : vector<4x512xf32>
    %73 = arith.addf %72, %0 : vector<4x512xf32>
    %c0_14 = arith.constant 0 : index
    %c0_15 = arith.constant 0 : index
    %74 = vector.load %arg7[%c0_14, %c0_15] : memref<4x512xf32, #tpu.memory_space<vmem>>, vector<4x512xf32>
    tpu.vector_store %arg7[%c0_14, %c0_15], %73 {strides = array<i32>} : memref<4x512xf32, #tpu.memory_space<vmem>>, vector<4x512xf32>,
    return
  }
  func.func @transform_0(%arg0: i32) -> (i32, i32) {
    %c0_i32 = arith.constant 0 : i32
    %c0_i32_0 = arith.constant 0 : i32
    %c0_i32_1 = arith.constant 0 : i32
    return %c0_i32, %c0_i32_0 : i32, i32
  }
  func.func @transform_1(%arg0: i32) -> (i32, i32) {
    %c0_i32 = arith.constant 0 : i32
    %c0_i32_0 = arith.constant 0 : i32
    %c0_i32_1 = arith.constant 0 : i32
    return %c0_i32, %c0_i32_0 : i32, i32
  }
  func.func @transform_2(%arg0: i32) -> (i32, i32) {
    %c0_i32 = arith.constant 0 : i32
    %c0_i32_0 = arith.constant 0 : i32
    %c0_i32_1 = arith.constant 0 : i32
    return %c0_i32, %c0_i32_0 : i32, i32
  }
  func.func @transform_3(%arg0: i32) -> (i32, i32) {
    %c0_i32 = arith.constant 0 : i32
    %c0_i32_0 = arith.constant 0 : i32
    %c0_i32_1 = arith.constant 0 : i32
    return %c0_i32, %c0_i32_0 : i32, i32
  }
  func.func @transform_4(%arg0: i32) -> (i32, i32) {
    %c0_i32 = arith.constant 0 : i32
    %c0_i32_0 = arith.constant 0 : i32
    %c0_i32_1 = arith.constant 0 : i32
    return %c0_i32, %c0_i32_0 : i32, i32
  }
  func.func @transform_5(%arg0: i32) -> (i32, i32) {
    %c0_i32 = arith.constant 0 : i32
    %c0_i32_0 = arith.constant 0 : i32
    %c0_i32_1 = arith.constant 0 : i32
    return %c0_i32, %c0_i32_0 : i32, i32
  }
  func.func @transform_6(%arg0: i32) -> (i32, i32) {
    %c0_i32 = arith.constant 0 : i32
    %c0_i32_0 = arith.constant 0 : i32
    %c0_i32_1 = arith.constant 0 : i32
    return %c0_i32, %c0_i32_0 : i32, i32
  }
}

</mosaic_0001>

<bundles_post_ra>
// kernel: tpu_custom_call.1
= control target key start
LH: loop header
LB: loop body
LE: loop exit
PB: predicated region body
PF: predicated region fallthrough
CT: control target
= control target key end

     0   :  { %11 = vsyncpa [#allocation3], 0  ;;  %s1473_s0 = inlined_call_operand.hbm [shape: f32[4,512], index: 0, kind: input, shape index: {}]   ;;  %s1474_s1 = inlined_call_operand.vmem [shape: f32[2,4], index: 1, kind: input, shape index: {}]   ;;  %s1475_s2 = inlined_call_operand.vmem [shape: f32[2,1], index: 2, kind: input, shape index: {}]   ;;  %s1476_s3 = inlined_call_operand.vmem [shape: f32[4,18], index: 3, kind: input, shape index: {}]   ;;  %s1477_s4 = inlined_call_operand.vmem [shape: f32[4,1], index: 4, kind: input, shape index: {}]   ;;  %s1478_s5 = inlined_call_operand.hbm [shape: f32[9,512], index: 5, kind: input, shape index: {}]   ;;  %s1479_s6 = inlined_call_operand.hbm [shape: f32[4,512], index: 6, kind: output, shape index: {}]  }
   0x1   :  { %12 = vsyncpa [#allocation6], 0 }
   0x2   :  { %13 = vsyncpa [#allocation4], 0  ;;  %s1040_s21 = smov [#allocation2]   ;;  %s1041_s23 = smov [#allocation5]  }
   0x3   :  { %s20_s22 = sshll.u32 %s1040_s21, 4  ;;  %s37_s24 = sshll.u32 %s1041_s23, 4  ;;  %s21_s22 = int_to_ptr.vmem [resolvable:$true] %s20_s22  ;;  %s1090_s24 = int_to_ptr.vmem [resolvable:$true] %s37_s24 }
   0x4   :  { %s968_s27 = scalar_lea.hbm %s1473_s0, 256 }
   0x5   :  { %p969_p0 = scmp.ne.s32.totalorder %s1473_s0, %s968_s27  ;;  %p972_p1 = scmp.lt.u32.totalorder %s968_s27, %s1473_s0 }
   0x7   :  { %p974_p2 = pnand %p972_p1, %p969_p0 }
   0x9   :  { %977 = shalt.err (!%p974_p2)
}
   0xa   :  { %s978_s8 = scalar_lea.vmem %s21_s22, 256  ;;  %p983_p4 = scmp.lt.s32.totalorder %s21_s22, %s21_s22 }
   0xb   :  { %p979_p3 = scmp.ne.s32.totalorder %s21_s22, %s978_s8  ;;  %p984_p5 = scmp.lt.s32.totalorder %s978_s8, %s978_s8 }
   0xd   :  { %p985_p6 = por %p984_p5, %p983_p4 }
   0xf   :  { %p986_p7 = pnand %p985_p6, %p979_p3 }
  0x11   :  { %989 = shalt.err (!%p986_p7)
}
  0x12   :  { %23 = dma.hbm_to_vmem [thread:$0]  %s1473_s0, 256, %s21_s22, [#allocation3]  }
  0x13   :  { %s990_s13 = scalar_lea.hbm %s1478_s5, 1024 }
  0x14   :  { %p991_p8 = scmp.ne.s32.totalorder %s1478_s5, %s990_s13  ;;  %p994_p9 = scmp.lt.u32.totalorder %s990_s13, %s1478_s5 }
  0x16   :  { %p996_p10 = pnand %p994_p9, %p991_p8 }
  0x18   :  { %999 = shalt.err (!%p996_p10)
}
  0x19   :  { %s1000_s18 = scalar_lea.vmem %s1090_s24, 1024  ;;  %p1005_p12 = scmp.lt.s32.totalorder %s1090_s24, %s1090_s24 }
  0x1a   :  { %p1001_p11 = scmp.ne.s32.totalorder %s1090_s24, %s1000_s18  ;;  %p1006_p13 = scmp.lt.s32.totalorder %s1000_s18, %s1000_s18 }
  0x1c   :  { %p1007_p0 = por %p1006_p13, %p1005_p12 }
  0x1e   :  { %p1008_p1 = pnand %p1007_p0, %p1001_p11 }
  0x20   :  { %1011 = shalt.err (!%p1008_p1)
}
  0x21   :  { %s1042_s0 = smov 512   ;;  %s1043_s19 = smov 32  }
  0x22   :  { %43 = dma.hbm_to_vmem [thread:$0]  %s1478_s5, 1024, %s1090_s24, [#allocation6], %s1042_s0, %s1042_s0, %s1043_s19  }
  0x23   :  { %1034 = dma.done.wait [#allocation3], 256  }
  0x24   :  { %1035 = vsyncadd [#allocation3], 4294967040 }
  0x25   :  { %1036 = dma.done.wait [#allocation6], 1024  }
  0x26   :  { %1037 = vsyncadd [#allocation6], 4294966272  ;;  %v1044_v0 = vmov 0.0   ;;  %v1045_v1 = vmov 0   ;;  %v1121_v2 = vld [vmem:[#allocation2] sm:$0xff]  ;;  %vm67_vm0 = vcmask 1043456   ;;  %v276_v46 = vlaneseq }
  0x27   :  { %140 = vmatprep.mubr.f32.mxu0 %v1044_v0  ;;  %211 = vmatprep.mubr.f32.mxu1 %v1044_v0  ;;  %v1123_v3 = vld [vmem:[#allocation2 + $0x8] sm:$0xff]  ;;  %v1127_v4 = vcombine.high %v1121_v2, %v1121_v2  ;;  %v53_v6 = vld [vmem:[%s1475_s2] sm:$0x3]  ;;  %vm63_vm1 = vcmask 31744   ;;  %s1047_s2 = smov 127   ;;  %s1048_s25 = smov 15  }
  0x28   :  { %932 = vset.pattern.permute.xlu0 %v1045_v1  ;;  %933 = vset.pattern.permute.xlu1 %v1045_v1  ;;  %v1131_v5 = vcombine.high %v1123_v3, %v1123_v3  ;;  %v52_v7 = vld [vmem:[%s1474_s1] sm:$0x3]  ;;  %s1046_s1 = smov 16   ;;  %s1049_s26 = smov 113   ;;  %v277_v49 = vshrl.u32 %v276_v46, 7  ;;  %v1224_v53 = vld [vmem:[#allocation5 + $0x8] sm:$0xff] }
  0x29   :  { %56 = vperm.xlu0 %932, %v53_v6   ;;  %885 = vmatprep.subr.msk.mxu0 %vm67_vm0, %v1127_v4  ;;  %s1050_s27 = smov 17   ;;  %s1051_s28 = smov 112   ;;  %v661_v37 = vld [vmem:[%s1477_s4] sm:$0xf]  ;;  %v1228_v55 = vld [vmem:[#allocation5] sm:$0xff]  ;;  %v1232_v57 = vld [vmem:[#allocation5 + $0x18] sm:$0xff] }
  0x2a   :  { %888 = vmatprep.subr.msk.mxu1 %vm67_vm0, %v1131_v5  ;;  %886 = vmatpush1.msk.msra.mxu0 %vm67_vm0, %v1121_v2  ;;  %s1052_s29 = smov 1   ;;  %s1053_s30 = smov 111   ;;  %v1222_v52 = vsub.s32 1, %v277_v49  ;;  %v1226_v54 = vld [vmem:[#allocation5 + $0x10] sm:$0xff]  ;;  %v1230_v56 = vsub.s32 2, %v277_v49  ;;  %v1234_v58 = vsub.s32 5, %v277_v49 }
  0x2b   :  { %889 = vmatpush1.msk.msra.mxu1 %vm67_vm0, %v1123_v3  ;;  %887 = vmatmul.mubr.msk.f32.vlgmr.msra.gmra.mrb[0].mxu0 %vm63_vm1, %v52_v7  ;;  %vm305_vm2 = vcmask 130048   ;;  %vm343_vm3 = vcmask 121856   ;;  %vm418_vm4 = vcmask 1039360   ;;  %vm267_vm5 = vcmask 138240  }
  0x2c   :  { %890 = vmatmul.mubr.msk.f32.vlgmr.msra.gmra.mrb[0].mxu1 %vm63_vm1, %v52_v7  ;;  %747 = vmatprep.mubr.f32.mxu0 %v1044_v0  ;;  %v321_v61 = vrot.slane %v1224_v53, %v1222_v52  ;;  %v325_v62 = vrot.slane %v1226_v54, %v1222_v52  ;;  %v317_v63 = vrot.slane %v1228_v55, %v1222_v52  ;;  %v1250_v7 = vsub.s32 6, %v277_v49 }
  0x2d   :  { %818 = vmatprep.mubr.f32.mxu1 %v1044_v0  ;;  %v1244_v0 = vsub.s32 0, %v277_v49  ;;  %v329_v1 = vrot.slane %v1232_v57, %v1222_v52  ;;  %v355_v6 = vrot.slane %v1228_v55, %v1230_v56  ;;  %vm456_vm6 = vcmask 924672  }
  0x2e   :  { %vm634_vm7 = vcmask 1041408   ;;  %vm381_vm8 = vcmask 7168   ;;  %vm494_vm9 = vcmask 916480   ;;  %vm643_vm10 = vcmask 1045504  }
  0x2f   :  { %vm532_vm11 = vcmask 908288   ;;  %vm667_vm12 = vcmask 146432  }
  0xa8   :  { %v57_v8 = vpop.permute.xlu0 %56 }
  0xfe   :  { %v142_v9 = vpop.f32.mrb[0].mxu0 }
  0xff   :  { %v213_v10 = vpop.f32.mrb[0].mxu1  ;;  %v143_v11 = vadd.f32 %v142_v9, %v57_v8  ;;  %v144_v13 = vpop.f32.mrb[1].mxu0  ;;  %v431_v9 = vrot.slane %v1228_v55, %v1234_v58 }
 0x100   :  { %v214_v12 = vadd.f32 %v213_v10, %v57_v8  ;;  %v215_v14 = vpop.f32.mrb[1].mxu1  ;;  %v145_v18 = vadd.f32 %v144_v13, %v57_v8  ;;  %v1256_v10 = vsub.s32 3, %v277_v49  ;;  %v359_v13 = vrot.slane %v1224_v53, %v1230_v56 }
 0x101   :  { %v891_v15 = vmul.f32 -1.442695, %v143_v11  ;;  %v216_v23 = vadd.f32 %v215_v14, %v57_v8  ;;  %v367_v8 = vrot.slane %v1232_v57, %v1230_v56  ;;  %v363_v14 = vrot.slane %v1226_v54, %v1230_v56 }
 0x102   :  { %v893_v16 = vmul.f32 -1.442695, %v214_v12  ;;  %v892_v22 = vmul.f32 -1.442695, %v145_v18 }
 0x103   :  { %936 = vpow2.f32 %v891_v15  ;;  %v894_v24 = vmul.f32 -1.442695, %v216_v23  ;;  %v1264_v15 = vsub.s32 7, %v277_v49 }
 0x104   :  { %938 = vpow2.f32 %v893_v16 }
 0x10d   :  { %v937_v17 = vpop.eup %936 }
 0x10e   :  { %v939_v19 = vpop.eup %938  ;;  %v230_v20 = vadd.f32 1.0, %v937_v17  ;;  %v439_v17 = vrot.slane %v1226_v54, %v1234_v58 }
 0x10f   :  { %v232_v21 = vadd.f32 1.0, %v939_v19  ;;  %v279_v19 = vrot.slane %v1228_v55, %v1244_v0 }
 0x110   :  { %940 = vrcp.f32 %v230_v20  ;;  %v291_v20 = vrot.slane %v1232_v57, %v1244_v0 }
 0x111   :  { %942 = vrcp.f32 %v232_v21  ;;  %v469_v21 = vrot.slane %v1228_v55, %v1250_v7 }
 0x112   :  { %944 = vpow2.f32 %v892_v22 }
 0x113   :  { %946 = vpow2.f32 %v894_v24 }
 0x11a   :  { %v941_v25 = vpop.eup %940 }
 0x11b   :  { %v943_v26 = vpop.eup %942  ;;  %v1147_v27 = vmul.f32 %v941_v25, %v143_v11 }
 0x11c   :  { %v1149_v28 = vmul.f32 %v943_v26, %v214_v12  ;;  %v945_v29 = vpop.eup %944  ;;  %v435_v12 = vrot.slane %v1224_v53, %v1234_v58 }
 0x11d   :  { %299 = vrot.lane.b32.xlu1 %v1147_v27, %s1046_s1  ;;  %v231_v30 = vadd.f32 1.0, %v945_v29  ;;  %v947_v31 = vpop.eup %946 }
 0x11e   :  { %303 = vrot.lane.b32.xlu0 %v1149_v28, %s1046_s1  ;;  %v233_v32 = vadd.f32 1.0, %v947_v31 }
 0x11f   :  { %948 = vrcp.f32 %v231_v30 }
 0x120   :  { %950 = vrcp.f32 %v233_v32 }
 0x121   :  { %410 = vrot.lane.b32.xlu1 %v1147_v27, %s1047_s2 }
 0x122   :  { %337 = vrot.lane.b32.xlu0 %v1147_v27, %s1048_s25 }
 0x125   :  { %414 = vrot.lane.b32.xlu1 %v1149_v28, %s1047_s2 }
 0x126   :  { %341 = vrot.lane.b32.xlu0 %v1149_v28, %s1048_s25 }
 0x129   :  { %448 = vrot.lane.b32.xlu1 %v1147_v27, %s1049_s26  ;;  %v949_v33 = vpop.eup %948 }
 0x12a   :  { %261 = vrot.lane.b32.xlu0 %v1147_v27, %s1050_s27  ;;  %v1167_v34 = vmul.f32 %v949_v33, %v145_v18  ;;  %v951_v35 = vpop.eup %950  ;;  %v443_v18 = vrot.slane %v1232_v57, %v1234_v58 }
 0x12b   :  { %v1172_v36 = vmul.f32 %v951_v35, %v216_v23  ;;  %v283_v23 = vrot.slane %v1224_v53, %v1244_v0 }
 0x12d   :  { %452 = vrot.lane.b32.xlu1 %v1149_v28, %s1049_s26 }
 0x12e   :  { %265 = vrot.lane.b32.xlu0 %v1149_v28, %s1050_s27 }
 0x131   :  { %486 = vrot.lane.b32.xlu1 %v1147_v27, %s1051_s28 }
 0x132   :  { %375 = vrot.lane.b32.xlu0 %v1147_v27, %s1052_s29 }
 0x135   :  { %301 = vrot.lane.b32.xlu1 %v1167_v34, %s1046_s1 }
 0x136   :  { %379 = vrot.lane.b32.xlu0 %v1149_v28, %s1052_s29 }
 0x139   :  { %334 = vrot.lane.b32.xlu1 %v1172_v36, %s1048_s25 }
 0x13a   :  { %296 = vrot.lane.b32.xlu0 %v1172_v36, %s1046_s1 }
 0x13d   :  { %339 = vrot.lane.b32.xlu1 %v1167_v34, %s1048_s25 }
 0x13e   :  { %412 = vrot.lane.b32.xlu0 %v1167_v34, %s1047_s2 }
 0x141   :  { %255 = vrot.lane.b32.xlu1 %v1172_v36, %s1050_s27 }
 0x142   :  { %416 = vrot.lane.b32.xlu0 %v1172_v36, %s1047_s2 }
 0x145   :  { %263 = vrot.lane.b32.xlu1 %v1167_v34, %s1050_s27 }
 0x146   :  { %450 = vrot.lane.b32.xlu0 %v1167_v34, %s1049_s26 }
 0x149   :  { %372 = vrot.lane.b32.xlu1 %v1172_v36, %s1052_s29 }
 0x14a   :  { %454 = vrot.lane.b32.xlu0 %v1172_v36, %s1049_s26 }
 0x14d   :  { %377 = vrot.lane.b32.xlu1 %v1167_v34, %s1052_s29 }
 0x14e   :  { %488 = vrot.lane.b32.xlu0 %v1167_v34, %s1051_s28 }
 0x151   :  { %490 = vrot.lane.b32.xlu1 %v1149_v28, %s1051_s28 }
 0x152   :  { %492 = vrot.lane.b32.xlu0 %v1172_v36, %s1051_s28 }
 0x155   :  { %524 = vrot.lane.b32.xlu1 %v1147_v27, %s1053_s30 }
 0x156   :  { %526 = vrot.lane.b32.xlu0 %v1167_v34, %s1053_s30 }
 0x159   :  { %528 = vrot.lane.b32.xlu1 %v1149_v28, %s1053_s30 }
 0x15a   :  { %530 = vrot.lane.b32.xlu0 %v1172_v36, %s1053_s30 }
 0x15d   :  { %664 = vperm.xlu1 %933, %v661_v37  }
 0x18f   :  { %v1198_v38 = vpop.permute.xlu1 %299 }
 0x190   :  { %v1200_v39 = vpop.permute.xlu0 %303 }
 0x193   :  { %v1202_v40 = vpop.permute.xlu1 %410 }
 0x194   :  { %v1204_v41 = vpop.permute.xlu0 %337 }
 0x197   :  { %v1206_v42 = vpop.permute.xlu1 %414 }
 0x198   :  { %v1208_v43 = vpop.permute.xlu0 %341 }
 0x19b   :  { %v1210_v44 = vpop.permute.xlu1 %448 }
 0x19c   :  { %v1212_v45 = vpop.permute.xlu0 %261 }
 0x19f   :  { %v1214_v47 = vpop.permute.xlu1 %452 }
 0x1a0   :  { %v1216_v48 = vpop.permute.xlu0 %265 }
 0x1a3   :  { %v1218_v50 = vpop.permute.xlu1 %486 }
 0x1a4   :  { %v1220_v51 = vpop.permute.xlu0 %375 }
 0x1a7   :  { %v302_v59 = vpop.permute.xlu1 %301 }
 0x1a8   :  { %v1236_v60 = vpop.permute.xlu0 %379  ;;  %v306_v30 = vsel %vm305_vm2, %v1198_v38, %v302_v59  ;;  %v307_v37 = vsel %vm305_vm2, %v302_v59, %v1200_v39 }
 0x1a9   :  { %v1312_v32 = vmul.f32 %v321_v61, %v306_v30  ;;  %v1320_v26 = vmul.f32 %v325_v62, %v307_v37 }
 0x1ab   :  { %v335_v11 = vpop.permute.xlu1 %334 }
 0x1ac   :  { %v297_v16 = vpop.permute.xlu0 %296  ;;  %v351_v46 = vsel %vm343_vm3, %v335_v11, %v1204_v41  ;;  %v346_v33 = vsel %vm343_vm3, %v1208_v43, %v335_v11 }
 0x1ad   :  { %v313_v58 = vsel %vm305_vm2, %v297_v16, %v1198_v38  ;;  %v308_v52 = vsel %vm305_vm2, %v1200_v39, %v297_v16  ;;  %v511_v38 = vrot.slane %v1224_v53, %v1264_v15  ;;  %v368_v11 = vmul.f32 %v355_v6, %v351_v46 }
 0x1ae   :  { %v330_v24 = vmul.f32 %v317_v63, %v313_v58  ;;  %v1324_v61 = vmul.f32 %v367_v8, %v346_v33  ;;  %v515_v8 = vrot.slane %v1226_v54, %v1264_v15 }
 0x1af   :  { %v340_v31 = vpop.permute.xlu1 %339  ;;  %v578_v33 = vrot.slane %v368_v11, 4 }
 0x1b0   :  { %v413_v49 = vpop.permute.xlu0 %412  ;;  %v344_v56 = vsel %vm343_vm3, %v1204_v41, %v340_v31  ;;  %v345_v25 = vsel %vm343_vm3, %v340_v31, %v1208_v43  ;;  %v333_v41 = vmul.f32 %v329_v1, %v308_v52  ;;  %v567_v43 = vrot.slane %v1312_v32, 6 }
 0x1b1   :  { %v419_v59 = vsel %vm418_vm4, %v1202_v40, %v413_v49  ;;  %v420_v35 = vsel %vm418_vm4, %v413_v49, %v1206_v42  ;;  %v1328_v16 = vmul.f32 %v359_v13, %v344_v56 }
 0x1b2   :  { %v444_v29 = vmul.f32 %v431_v9, %v419_v59  ;;  %v445_v30 = vmul.f32 %v435_v12, %v420_v35  ;;  %v1335_v9 = vmul.f32 %v363_v14, %v345_v25  ;;  %v568_v12 = vrot.slane %v1320_v26, 6 }
 0x1b3   :  { %v256_v49 = vpop.permute.xlu1 %255  ;;  %v566_v25 = vrot.slane %v330_v24, 6  ;;  %v579_v35 = vrot.slane %v1328_v16, 4 }
 0x1b4   :  { %v417_v22 = vpop.permute.xlu0 %416  ;;  %v275_v39 = vsel %vm267_vm5, %v256_v49, %v1212_v45  ;;  %v602_v1 = vrot.slane %v444_v29, 6  ;;  %v270_v13 = vsel %vm267_vm5, %v1216_v48, %v256_v49  ;;  %v580_v26 = vrot.slane %v1335_v9, 4 }
 0x1b5   :  { %v421_v62 = vsel %vm418_vm4, %v1206_v42, %v417_v22  ;;  %v427_v6 = vsel %vm418_vm4, %v417_v22, %v1202_v40  ;;  %v292_v31 = vmul.f32 %v279_v19, %v275_v39  ;;  %v581_v40 = vrot.slane %v1324_v61, 4 }
 0x1b6   :  { %v446_v63 = vmul.f32 %v439_v17, %v421_v62  ;;  %v603_v22 = vrot.slane %v445_v30, 6  ;;  %v447_v32 = vmul.f32 %v443_v18, %v427_v6  ;;  %v569_v17 = vrot.slane %v333_v41, 6 }
 0x1b7   :  { %v264_v42 = vpop.permute.xlu1 %263  ;;  %v295_v19 = vmul.f32 %v291_v20, %v270_v13  ;;  %v648_v18 = vsel %vm634_vm7, %v1147_v27, %v602_v1  ;;  %v635_v24 = vsel %vm634_vm7, %v292_v31, %v566_v25  ;;  %v1480_v41 = vrot.slane %v1224_v53, %v1250_v7 }
 0x1b8   :  { %v451_v14 = vpop.permute.xlu0 %450  ;;  %v604_v29 = vrot.slane %v446_v63, 6  ;;  %v268_v46 = vsel %vm267_vm5, %v1212_v45, %v264_v42  ;;  %v649_v59 = vsel %vm634_vm7, %v1167_v34, %v603_v22  ;;  %v605_v20 = vrot.slane %v447_v32, 6 }
 0x1b9   :  { %v457_v37 = vsel %vm456_vm6, %v1210_v44, %v451_v14  ;;  %v458_v52 = vsel %vm456_vm6, %v451_v14, %v1214_v47  ;;  %v269_v45 = vsel %vm267_vm5, %v264_v42, %v1216_v48  ;;  %v293_v49 = vmul.f32 %v283_v23, %v268_v46 }
 0x1ba   :  { %v482_v56 = vmul.f32 %v469_v21, %v457_v37  ;;  %v650_v48 = vsel %vm634_vm7, %v1149_v28, %v604_v29  ;;  %v638_v30 = vsel %vm634_vm7, %v295_v19, %v569_v17  ;;  %v639_v39 = vsel %vm67_vm0, %v635_v24, %v578_v33 }
 0x1bb   :  { %v373_v58 = vpop.permute.xlu1 %372  ;;  %v483_v23 = vmul.f32 %v1480_v41, %v458_v52  ;;  %v1483_v28 = vrot.slane %v1228_v55, %v1256_v10  ;;  %v1484_v13 = vrot.slane %v1232_v57, %v1250_v7  ;;  %v1485_v42 = vrot.slane %v1232_v57, %v1256_v10 }
 0x1bc   :  { %v455_v11 = vpop.permute.xlu0 %454  ;;  %v389_v27 = vsel %vm381_vm8, %v373_v58, %v1220_v51  ;;  %v384_v34 = vsel %vm381_vm8, %v1236_v60, %v373_v58  ;;  %v614_v62 = vrot.slane %v482_v56, 4  ;;  %v651_v14 = vsel %vm634_vm7, %v1172_v36, %v605_v20 }
 0x1bd   :  { %v459_v21 = vsel %vm456_vm6, %v1214_v47, %v455_v11  ;;  %v465_v61 = vsel %vm456_vm6, %v455_v11, %v1210_v44  ;;  %v1481_v47 = vrot.slane %v1226_v54, %v1244_v0  ;;  %v1482_v44 = vrot.slane %v1226_v54, %v1250_v7 }
 0x1be   :  { %v406_v63 = vmul.f32 %v1483_v28, %v389_v27  ;;  %v485_v31 = vmul.f32 %v1484_v13, %v465_v61  ;;  %v409_v33 = vmul.f32 %v1485_v42, %v384_v34  ;;  %v636_v25 = vsel %vm634_vm7, %v293_v49, %v567_v43 }
 0x1bf   :  { %v294_v6 = vmul.f32 %v1481_v47, %v269_v45  ;;  %v484_v9 = vmul.f32 %v1482_v44, %v459_v21  ;;  %v378_v1 = vpop.permute.xlu1 %377  ;;  %v1486_v17 = vrot.slane %v1224_v53, %v1256_v10  ;;  %v615_v29 = vrot.slane %v483_v23, 4 }
 0x1c0   :  { %v489_v22 = vpop.permute.xlu0 %488  ;;  %v382_v0 = vsel %vm381_vm8, %v1220_v51, %v378_v1  ;;  %v383_v32 = vsel %vm381_vm8, %v378_v1, %v1236_v60  ;;  %v1487_v51 = vrot.slane %v1228_v55, %v1264_v15  ;;  %v1488_v60 = vrot.slane %v1226_v54, %v1256_v10 }
 0x1c1   :  { %v495_v7 = vsel %vm494_vm9, %v1218_v50, %v489_v22  ;;  %v407_v37 = vmul.f32 %v1486_v17, %v382_v0  ;;  %v642_v36 = vsel %vm67_vm0, %v638_v30, %v581_v40  ;;  %v652_v43 = vsel %vm67_vm0, %v648_v18, %v614_v62 }
 0x1c2   :  { %v520_v19 = vmul.f32 %v1487_v51, %v495_v7  ;;  %v408_v46 = vmul.f32 %v1488_v60, %v383_v32  ;;  %v637_v24 = vsel %vm634_vm7, %v294_v6, %v568_v12  ;;  %v616_v52 = vrot.slane %v484_v9, 4  ;;  %v898_v9 = vld [vmem:[#allocation5 + $0x38] ss:$0 sm:$0xff]  ;;  %v897_v32 = vld [vmem:[#allocation5 + $0x30] ss:$0 sm:$0xff] }
 0x1c3   :  { %v590_v56 = vrot.slane %v406_v63, 2  ;;  %v491_v58 = vpop.permute.xlu1 %490  ;;  %v617_v20 = vrot.slane %v485_v31, 4  ;;  %v593_v45 = vrot.slane %v409_v33, 2  ;;  %v591_v49 = vrot.slane %v407_v37, 2  ;;  %v895_v31 = vld [vmem:[#allocation5 + $0x20] ss:$0 sm:$0xff] }
 0x1c4   :  { %v626_v11 = vrot.slane %v520_v19, 2  ;;  %v493_v27 = vpop.permute.xlu0 %492  ;;  %v496_v55 = vsel %vm494_vm9, %v489_v22, %v491_v58  ;;  %v641_v12 = vsel %vm67_vm0, %v637_v24, %v580_v26  ;;  %v592_v18 = vrot.slane %v408_v46, 2  ;;  %v660_v37 = vld [vmem:[%s1476_s3] sm:$0xf]  ;;  %s1054_s3 = smov [#allocation7]  }
 0x1c5   :  { %v503_v10 = vsel %vm494_vm9, %v493_v27, %v1218_v50  ;;  %v497_v21 = vsel %vm494_vm9, %v491_v58, %v493_v27  ;;  %v521_v40 = vmul.f32 %v511_v38, %v496_v55  ;;  %v1489_v61 = vrot.slane %v1232_v57, %v1264_v15  ;;  %s875_s10 = sshll.u32 %s1054_s3, 4  ;;  %s876_s10 = int_to_ptr.vmem [resolvable:$true] %s875_s10 }
 0x1c6   :  { %v522_v30 = vmul.f32 %v515_v8, %v497_v21  ;;  %v644_v41 = vsel %vm643_vm10, %v639_v39, %v590_v56  ;;  %v640_v53 = vsel %vm67_vm0, %v636_v25, %v579_v35  ;;  %v653_v38 = vsel %vm67_vm0, %v649_v59, %v615_v29  ;;  %v896_v59 = vld [vmem:[#allocation5 + $0x28] ss:$0 sm:$0xff]  ;;  %s1012_s11 = scalar_lea.vmem %s876_s10, 256  ;;  %p1017_p3 = scmp.lt.s32.totalorder %s876_s10, %s876_s10 }
 0x1c7   :  { %v523_v34 = vmul.f32 %v1489_v61, %v503_v10  ;;  %v627_v50 = vrot.slane %v521_v40, 2  ;;  %v525_v23 = vpop.permute.xlu1 %524  ;;  %v654_v26 = vsel %vm67_vm0, %v650_v48, %v616_v52  ;;  %v656_v62 = vsel %vm643_vm10, %v652_v43, %v626_v11  ;;  %p1013_p2 = scmp.ne.s32.totalorder %s876_s10, %s1012_s11  ;;  %p1018_p4 = scmp.lt.s32.totalorder %s1012_s11, %s1012_s11 }
 0x1c8   :  { %v628_v47 = vrot.slane %v522_v30, 2  ;;  %v527_v6 = vpop.permute.xlu0 %526  ;;  %v645_v54 = vsel %vm643_vm10, %v640_v53, %v591_v49  ;;  %v647_v8 = vsel %vm643_vm10, %v642_v36, %v593_v45  ;;  %v655_v39 = vsel %vm67_vm0, %v651_v14, %v617_v20 }
 0x1c9   :  { %v629_v57 = vrot.slane %v523_v34, 2  ;;  %v657_v15 = vsel %vm643_vm10, %v653_v38, %v627_v50  ;;  %v646_v16 = vsel %vm643_vm10, %v641_v12, %v592_v18  ;;  %v911_v1 = vpack.c.bf16 %v656_v62, %v644_v41  ;;  %p1019_p5 = por %p1018_p4, %p1017_p3 }
 0x1ca   :  { %v658_v35 = vsel %vm643_vm10, %v654_v26, %v628_v47  ;;  %v909_v44 = vpack.c.bf16 %v657_v15, %v645_v54  ;;  %v533_v42 = vsel %vm532_vm11, %v525_v23, %v527_v6 }
 0x1cb   :  { %v659_v48 = vsel %vm643_vm10, %v655_v39, %v629_v57  ;;  %v529_v28 = vpop.permute.xlu1 %528  ;;  %v915_v13 = vpack.c.bf16 %v658_v35, %v646_v16  ;;  %v558_v17 = vmul.f32 %v895_v31, %v533_v42  ;;  %p1020_p6 = pnand %p1019_p5, %p1013_p2 }
 0x1cc   :  { %v913_v63 = vpack.c.bf16 %v659_v48, %v647_v8  ;;  %v531_v33 = vpop.permute.xlu0 %530  ;;  %v534_v22 = vsel %vm532_vm11, %v527_v6, %v529_v28  ;;  %910 = vmatprep.subr.bf16.mxu0 %v909_v44 }
 0x1cd   :  { %v541_v0 = vsel %vm532_vm11, %v531_v33, %v525_v23  ;;  %v535_v14 = vsel %vm532_vm11, %v529_v28, %v531_v33  ;;  %v559_v25 = vmul.f32 %v896_v59, %v534_v22  ;;  %912 = vmatpush1.bf16.msra.mxu0 %v911_v1 }
 0x1ce   :  { %914 = vmatprep.subr.bf16.mxu1 %v913_v63  ;;  %v561_v7 = vmul.f32 %v898_v9, %v541_v0  ;;  %v560_v29 = vmul.f32 %v897_v32, %v535_v14 }
 0x1cf   :  { %916 = vmatpush1.bf16.msra.mxu1 %v915_v13  ;;  %899 = vmatprep.subr.msk.mxu0 %vm634_vm7, %v559_v25 }
 0x1d0   :  { %902 = vmatprep.subr.msk.mxu1 %vm634_vm7, %v561_v7 }
 0x1d1   :  { %900 = vmatpush1.msk.msra.mxu0 %vm634_vm7, %v558_v17 }
 0x1d2   :  { %901 = vmatmul.mubr.msk.f32.vlgmr.msra.gmra.mrb[2].mxu0 %vm667_vm12, %v660_v37 }
 0x1d3   :  { %903 = vmatpush1.msk.msra.mxu1 %vm634_vm7, %v560_v29 }
 0x1d4   :  { %904 = vmatmul.mubr.msk.f32.vlgmr.msra.gmra.mrb[2].mxu1 %vm667_vm12, %v660_v37 }
 0x1dc   :  { %v665_v51 = vpop.permute.xlu1 %664 }
 0x2a5   :  { %v749_v19 = vpop.f32.mrb[2].mxu0 }
 0x2a6   :  { %v750_v46 = vadd.f32 %v749_v19, %v665_v51  ;;  %v751_v36 = vpop.f32.mrb[3].mxu0 }
 0x2a7   :  { %v820_v60 = vpop.f32.mrb[2].mxu1  ;;  %v752_v24 = vadd.f32 %v751_v36, %v665_v51 }
 0x2a8   :  { %v821_v43 = vadd.f32 %v820_v60, %v665_v51  ;;  %v822_v52 = vpop.f32.mrb[3].mxu1  ;;  %v905_v56 = vmul.f32 -1.442695, %v750_v46 }
 0x2a9   :  { %v823_v58 = vadd.f32 %v822_v52, %v665_v51  ;;  %v906_v45 = vmul.f32 -1.442695, %v752_v24 }
 0x2aa   :  { %v907_v20 = vmul.f32 -1.442695, %v821_v43  ;;  %952 = vpow2.f32 %v905_v56 }
 0x2ab   :  { %v908_v11 = vmul.f32 -1.442695, %v823_v58 }
 0x2ac   :  { %954 = vpow2.f32 %v907_v20 }
 0x2ad   :  { %956 = vpow2.f32 %v906_v45 }
 0x2ae   :  { %958 = vpow2.f32 %v908_v11 }
 0x2b4   :  { %v953_v27 = vpop.eup %952 }
 0x2b5   :  { %v837_v49 = vadd.f32 1.0, %v953_v27 }
 0x2b6   :  { %v955_v55 = vpop.eup %954 }
 0x2b7   :  { %v957_v10 = vpop.eup %956  ;;  %v839_v21 = vadd.f32 1.0, %v955_v55  ;;  %960 = vrcp.f32 %v837_v49 }
 0x2b8   :  { %v959_v40 = vpop.eup %958  ;;  %v838_v12 = vadd.f32 1.0, %v957_v10 }
 0x2b9   :  { %962 = vrcp.f32 %v839_v21  ;;  %v840_v18 = vadd.f32 1.0, %v959_v40 }
 0x2ba   :  { %964 = vrcp.f32 %v838_v12 }
 0x2bb   :  { %966 = vrcp.f32 %v840_v18 }
 0x2c1   :  { %v961_v61 = vpop.eup %960 }
 0x2c2   :  { %v849_v30 = vmul.f32 %v961_v61, %v750_v46 }
 0x2c3   :  { %v963_v34 = vpop.eup %962 }
 0x2c4   :  { %v965_v41 = vpop.eup %964  ;;  %v851_v50 = vmul.f32 %v963_v34, %v821_v43  ;;  %v855_v38 = vadd.f32 %v849_v30, %v1121_v2 }
 0x2c5   :  { %v967_v23 = vpop.eup %966  ;;  %v850_v53 = vmul.f32 %v965_v41, %v752_v24 }
 0x2c6   :  { %v852_v26 = vmul.f32 %v967_v23, %v823_v58  ;;  %v857_v62 = vadd.f32 %v851_v50, %v1123_v3 }
 0x2c7   :  { %v856_v57 = vadd.f32 %v850_v53, %v1127_v4 }
 0x2c8   :  { %v858_v47 = vadd.f32 %v852_v26, %v1131_v5 }
 0x2c9   :  { %v863_v6 = vcombine.low %v855_v38, %v856_v57 }
 0x2ca   :  { %v864_v54 = vcombine.low %v857_v62, %v858_v47 }
 0x2cb   :  { %867 = vst [vmem:[#allocation7] sm:$0xff] %v863_v6 }
 0x2cc   :  { %868 = vst [vmem:[#allocation7 + $0x8] sm:$0xff] %v864_v54 }
 0x2cd   :  { %1023 = shalt.err (!%p1020_p6)
}
 0x2ce   :  { %s1024_s14 = scalar_lea.hbm %s1479_s6, 256 }
 0x2cf   :  { %p1025_p7 = scmp.ne.s32.totalorder %s1479_s6, %s1024_s14  ;;  %p1028_p8 = scmp.lt.u32.totalorder %s1024_s14, %s1479_s6 }
 0x2d1   :  { %p1030_p9 = pnand %p1028_p8, %p1025_p7 }
 0x2d3   :  { %1033 = shalt.err (!%p1030_p9)
}
 0x2d4   :  { %878 = dma.vmem_to_hbm [thread:$0]  %s876_s10, 256, %s1479_s6, [#allocation4]  }
 0x2d5   :  { %1038 = dma.done.wait [#allocation4], 256  }
 0x2d6   :  { %1039 = vsyncadd [#allocation4], 4294967040 }
 0x2d7   :  { %882 = vsyncpa [#allocation3], 1 }
 0x2d8   :  { %883 = vsyncpa [#allocation6], 1 }
 0x2d9   :  { %884 = vsyncpa [#allocation4], 1 }

</bundles_post_ra>
